<compile_context>
chip_gen: v5e
topology: v5e:2x2
jax: 0.10.0
libtpu: 0.0.40
codegen_flags: <defaults>
</compile_context>

<pallas_src>
import math
import numpy as np
import jax
import jax.numpy as jnp
from jax.experimental import pallas as pl
from jax.experimental.pallas import tpu as pltpu


# ----------------------------------------------------------------------------
# Static index-table construction (host-side glue, mirrors select_spiral()).
# ----------------------------------------------------------------------------
def make_triangle_wave(w, length):
    if w <= 1:
        return np.zeros(length, dtype=np.int64)
    base = list(range(0, w)) + list(range(w - 2, 0, -1))
    reps = length // len(base) + 1
    return np.array((base * reps)[:length], dtype=np.int64)


def build_row_idx(C, T, kernel_size):
    """Static (C, T) gather table replicating select_spiral's row_idx."""
    wave_table = [np.zeros(T, dtype=np.int64)]
    for w in range(1, kernel_size + 1):
        wave_table.append(make_triangle_wave(w, T))
    wave_table = np.stack(wave_table, axis=0)             # (kernel_size+1, T)
    c_range = np.arange(C)
    start_rows = np.clip(c_range - (kernel_size - 1), 0, None)
    window_sizes = c_range - start_rows + 1
    row_idx = start_rows[:, None] + wave_table[window_sizes, :]
    row_idx = np.minimum(row_idx, c_range[:, None])
    return row_idx                                          # (C, T)


def _round_up(a, b):
    return (a + b - 1) // b * b


def _vmem_capacity_bytes():
    try:
        return int(pltpu.get_tpu_info().vmem_capacity_bytes)
    except Exception:
        return 64 * 2 ** 20        # conservative fallback (v7x per-TC VMEM)


def _choose_t_tile(T, tile_cap):
    """Pick a T tile (multiple of 8, or == T) and the padded T it implies."""
    tile_cap = max(8, tile_cap)
    if T <= tile_cap:
        return T, T
    cap8 = (tile_cap // 8) * 8
    for cand in range(cap8, 7, -8):            # prefer a divisor of T (no padding)
        if T % cand == 0:
            return cand, T
    return cap8, _round_up(T, cap8)            # otherwise pad T up to a tile multiple


# ----------------------------------------------------------------------------
# Pallas kernel: spiral channel gather (XLU rolls + 2 selects) + pointwise conv.
# ----------------------------------------------------------------------------
def spiral_kernel(x_ref, m1_ref, m2_ref, wt_ref, b_ref, o_ref):
    x = x_ref[...]                                   # (Tt, Cp)
    # spiral gather: XLU lane rotations; wrapped-in lanes are masked off below
    x1 = pltpu.roll(x, shift=1, axis=1)              # x1[:, c] = x[:, c-1]
    x2 = pltpu.roll(x, shift=2, axis=1)              # x2[:, c] = x[:, c-2]
    h = jnp.where(m2_ref[...] != 0, x2,
                  jnp.where(m1_ref[...] != 0, x1, x))
    # pointwise Conv1d (kernel_size=1) == channel matmul + bias (f32 accumulate)
    y = jnp.dot(h.astype(wt_ref.dtype), wt_ref[...],
                preferred_element_type=jnp.float32)
    o_ref[...] = (y + b_ref[...]).astype(o_ref.dtype)


def spiral_attention_forward(x, conv_w, conv_b, kernel_size=3,
                             row_tile=1024, mxu_dtype=None,
                             single_buffer_consts=True):
    """x: (B, T, C). conv_w: (C_out, C, 1). conv_b: (C_out,). Returns (B, T, C_out)."""
    B, T, C = x.shape
    C_out = conv_w.shape[0]
    assert kernel_size <= 3, "kernel hardcodes channel shifts {0, 1, 2}"

    # --- static spiral tables -------------------------------------------------
    row_idx = build_row_idx(C, T, kernel_size)         # (C, T)
    shift = (np.arange(C)[:, None] - row_idx).T        # (T, C), values in {0,1,2}
    assert shift.min() >= 0 and shift.max() <= 2
    # roll-wraparound safety: a lane never gathers from left of lane 0, so
    # m1[:, 0] == 0 and m2[:, :2] == 0 and the rotate wrap is masked off.
    assert np.all(shift <= np.arange(C)[None, :])

    # --- padded / tiled sizes ---------------------------------------------------
    Cp = _round_up(C, 128)                 # lane-pad the contraction dim
    Np = _round_up(C_out, 128)             # lane-dense output (unmasked stores)
    cdt = jnp.dtype(mxu_dtype) if mxu_dtype is not None else jnp.dtype(x.dtype)
    xi = jnp.dtype(x.dtype).itemsize
    wi = jnp.dtype(cdt).itemsize

    # VMEM budget -> T tile, per TPU generation (v5e/v6e 128 MiB, v7x 64 MiB).
    cap = _vmem_capacity_bytes()
    budget = int(cap * 0.75)                                # headroom for scratch
    const_bytes = Cp * Np * wi + 8 * Np * 4                 # weight + padded bias
    per_row = 2 * Cp * xi + 2 * Np * xi + 4 * Cp * xi       # x, out dbl-buf + 2 masks dbl-buf
    rows_fit = max(8, (budget - const_bytes) // per_row)
    rows_fit = max(8, (rows_fit // 8) * 8)
    Tt, Tp = _choose_t_tile(T, min(row_tile, rows_fit))
    nT = Tp // Tt
    if B * nT < 2 and Tt % 16 == 0:        # keep >=2 parallel steps (v7x: 2 TCs)
        Tt //= 2
        nT = Tp // Tt

    # --- host-side constants ----------------------------------------------------
    m1_np = np.zeros((Tp, Cp), np.float32); m1_np[:T, :C] = (shift == 1)
    m2_np = np.zeros((Tp, Cp), np.float32); m2_np[:T, :C] = (shift == 2)
    m1 = jnp.asarray(m1_np, dtype=x.dtype)
    m2 = jnp.asarray(m2_np, dtype=x.dtype)

    wt_np = np.zeros((Cp, Np), np.float32)
    wt_np[:C, :C_out] = np.asarray(conv_w, np.float32).reshape(C_out, C).T
    wt = jnp.asarray(wt_np, dtype=cdt)
    bias_np = np.zeros((1, Np), np.float32)
    bias_np[0, :C_out] = np.asarray(conv_b, np.float32)
    bias = jnp.asarray(bias_np)

    xp = x
    if (Tp, Cp) != (T, C):                 # only pad (copy) when actually needed
        xp = jnp.pad(x, ((0, 0), (0, Tp - T), (0, Cp - C)))

    def _vmem_limit(nb_const):
        work = (2 * Tt * Cp * xi           # x block (double-buffered)
                + 2 * Tt * Np * xi         # out block (double-buffered)
                + 4 * Tt * Cp * xi         # m1 + m2 (double-buffered)
                + nb_const * (Cp * Np * wi + 8 * Np * 4))   # weight + bias
        return int(min(max(work + work // 4 + (2 << 20), 16 << 20),
                       int(cap * 0.9)))

    def _call(single_buffer):
        def const_spec(shape, index_map):
            if single_buffer:
                return pl.BlockSpec(shape, index_map, pipeline_mode=pl.Buffered(1))
            return pl.BlockSpec(shape, index_map)

        out = pl.pallas_call(
            spiral_kernel,
            out_shape=jax.ShapeDtypeStruct((B, Tp, Np), x.dtype),
            # T tiles outermost, batch innermost: the (Tt, Cp) mask block index
            # changes only once per T tile, so its fetch is elided across the
            # whole inner batch loop (mask HBM traffic ~ T*Cp, not B*T*Cp).
            grid=(nT, B),
            in_specs=[
                pl.BlockSpec((None, Tt, Cp), lambda t, b: (b, t, 0)),   # x
                pl.BlockSpec((Tt, Cp), lambda t, b: (t, 0)),            # m1
                pl.BlockSpec((Tt, Cp), lambda t, b: (t, 0)),            # m2
                const_spec((Cp, Np), lambda t, b: (0, 0)),              # weight^T
                const_spec((1, Np), lambda t, b: (0, 0)),               # bias
            ],
            out_specs=pl.BlockSpec((None, Tt, Np), lambda t, b: (b, t, 0)),
            compiler_params=pltpu.CompilerParams(
                dimension_semantics=("parallel", "parallel"),
                vmem_limit_bytes=_vmem_limit(1 if single_buffer else 2)),
        )(xp, m1, m2, wt, bias)
        return jax.block_until_ready(out)

    if single_buffer_consts:
        try:
            out = _call(True)
        except Exception:      # pipeline_mode / Buffered(1) unsupported -> fallback
            out = _call(False)
    else:
        out = _call(False)

    return out[:, :T, :C_out]


# ----------------------------------------------------------------------------
# Pure-JAX reference (mirrors the PyTorch forward exactly) for validation.
# ----------------------------------------------------------------------------
def reference_forward(x, conv_w, conv_b, kernel_size=3):
    B, T, C = x.shape
    C_out = conv_w.shape[0]
    X = jnp.transpose(x, (0, 2, 1))                        # (B, C, T)
    row_idx = jnp.asarray(build_row_idx(C, T, kernel_size))
    time_idx = jnp.broadcast_to(jnp.arange(T)[None, :], (C, T))
    H = X[:, row_idx, time_idx]                            # (B, C, T)
    W = conv_w.reshape(C_out, C)
    Y = jnp.einsum('oc,bct->bot', W, H) + conv_b[None, :, None]
    return jnp.transpose(Y, (0, 2, 1))                     # (B, T, C_out)


if __name__ == "__main__":
    B, T, C = 2, 8, 32          # batch, sequence length, n_embd (config.n_embd)
    key = jax.random.PRNGKey(0)
    kx, kw, kb = jax.random.split(key, 3)

    # Inputs are made exactly bf16-representable so the comparison is insensitive
    # to the MXU's f32-vs-bf16-pass matmul precision (accumulation is f32 anyway).
    def bf16_exact(a):
        return a.astype(jnp.bfloat16).astype(jnp.float32)

    x = bf16_exact(jax.random.normal(kx, (B, T, C), dtype=jnp.float32))

    # Deterministic Conv1d(C, C, kernel_size=1) parameters (PyTorch-style bound).
    bound = 1.0 / math.sqrt(C)  # fan_in = C * 1
    conv_w = bf16_exact(jax.random.uniform(kw, (C, C, 1), jnp.float32,
                                           minval=-bound, maxval=bound))
    conv_b = bf16_exact(jax.random.uniform(kb, (C,), jnp.float32,
                                           minval=-bound, maxval=bound))

    out = spiral_attention_forward(x, conv_w, conv_b)
    out = jax.block_until_ready(out)

    ref = reference_forward(x, conv_w, conv_b)
    assert out.shape == (B, T, C)
    np.testing.assert_allclose(np.asarray(out), np.asarray(ref),
                               atol=1e-5, rtol=1e-5)
    print("KERNEL_OK")
</pallas_src>

<mosaic_0001>
module attributes {stable_mosaic.version = 11 : i64} {
  func.func @spiral_kernel(%arg0: i32, %arg1: i32, %arg2: memref<1x8x128xf32, #tpu.memory_space<vmem>>, %arg3: memref<8x128xf32, #tpu.memory_space<vmem>>, %arg4: memref<8x128xf32, #tpu.memory_space<vmem>>, %arg5: memref<128x128xf32, #tpu.memory_space<vmem>>, %arg6: memref<1x128xf32, #tpu.memory_space<vmem>>, %arg7: memref<1x8x128xf32, #tpu.memory_space<vmem>>) attributes {dimension_semantics = [#tpu.dimension_semantics<parallel>, #tpu.dimension_semantics<parallel>], iteration_bounds = array<i64: 1, 2>, scalar_prefetch = 0 : i64, scratch_operands = 0 : i64, tpu.core_type = #tpu.core_type<tc>, window_params = [{transform_indices = @transform_0, window_bounds = array<i64: 1, 8, 128>}, {transform_indices = @transform_1, window_bounds = array<i64: 8, 128>}, {transform_indices = @transform_2, window_bounds = array<i64: 8, 128>}, {pipeline_mode = #tpu.pipeline_mode<synchronous>, transform_indices = @transform_3, window_bounds = array<i64: 128, 128>}, {pipeline_mode = #tpu.pipeline_mode<synchronous>, transform_indices = @transform_4, window_bounds = array<i64: 1, 128>}, {transform_indices = @transform_5, window_bounds = array<i64: 1, 8, 128>}]} {
    %c0 = arith.constant 0 : index
    %c0_0 = arith.constant 0 : index
    %c0_1 = arith.constant 0 : index
    %0 = vector.load %arg2[%c0, %c0_0, %c0_1] : memref<1x8x128xf32, #tpu.memory_space<vmem>>, vector<1x8x128xf32>
    %1 = vector.shape_cast %0 : vector<1x8x128xf32> to vector<8x128xf32>
    %c1_i32 = arith.constant 1 : i32
    %2 = tpu.dynamic_rotate %1 by %c1_i32 dim 1 : vector<8x128xf32>, i32 -> vector<8x128xf32>
    %c2_i32 = arith.constant 2 : i32
    %3 = tpu.dynamic_rotate %1 by %c2_i32 dim 1 : vector<8x128xf32>, i32 -> vector<8x128xf32>
    %c0_2 = arith.constant 0 : index
    %c0_3 = arith.constant 0 : index
    %4 = vector.load %arg4[%c0_2, %c0_3] : memref<8x128xf32, #tpu.memory_space<vmem>>, vector<8x128xf32>
    %cst = arith.constant 0.000000e+00 : f32
    %5 = vector.broadcast %cst : f32 to vector<8x128xf32>
    %6 = arith.cmpf one, %4, %5 : vector<8x128xf32>
    %c0_4 = arith.constant 0 : index
    %c0_5 = arith.constant 0 : index
    %7 = vector.load %arg3[%c0_4, %c0_5] : memref<8x128xf32, #tpu.memory_space<vmem>>, vector<8x128xf32>
    %cst_6 = arith.constant 0.000000e+00 : f32
    %8 = vector.broadcast %cst_6 : f32 to vector<8x128xf32>
    %9 = arith.cmpf one, %7, %8 : vector<8x128xf32>
    %10 = arith.select %9, %2, %1 : vector<8x128xi1>, vector<8x128xf32>
    %11 = arith.select %6, %3, %10 : vector<8x128xi1>, vector<8x128xf32>
    %c0_7 = arith.constant 0 : index
    %c0_8 = arith.constant 0 : index
    %12 = vector.load %arg5[%c0_7, %c0_8] : memref<128x128xf32, #tpu.memory_space<vmem>>, vector<128x128xf32>
    %cst_9 = arith.constant dense<0.000000e+00> : vector<8x128xf32>
    %13 = tpu.matmul %11, %12, %cst_9 {dimension_numbers = #tpu.dot_dimension_numbers<[1], [0], [0], [1], [0, 0, 1, 1], [], []>} : vector<8x128xf32>, vector<128x128xf32>, vector<8x128xf32> -> vector<8x128xf32>
    %c0_10 = arith.constant 0 : index
    %c0_11 = arith.constant 0 : index
    %14 = vector.load %arg6[%c0_10, %c0_11] : memref<1x128xf32, #tpu.memory_space<vmem>>, vector<1x128xf32>
    %15 = vector.broadcast %14 : vector<1x128xf32> to vector<8x128xf32>
    %16 = arith.addf %13, %15 : vector<8x128xf32>
    %c0_12 = arith.constant 0 : index
    %c0_13 = arith.constant 0 : index
    %c0_14 = arith.constant 0 : index
    %17 = vector.load %arg7[%c0_12, %c0_13, %c0_14] : memref<1x8x128xf32, #tpu.memory_space<vmem>>, vector<1x8x128xf32>
    %18 = vector.shape_cast %17 : vector<1x8x128xf32> to vector<8x128xf32>
    %19 = vector.shape_cast %16 : vector<8x128xf32> to vector<1x8x128xf32>
    tpu.vector_store %arg7[%c0_12, %c0_13, %c0_14], %19 {strides = array<i32>} : memref<1x8x128xf32, #tpu.memory_space<vmem>>, vector<1x8x128xf32>,
    return
  }
  func.func @transform_0(%arg0: i32, %arg1: i32) -> (i32, i32, i32) {
    %c0_i32 = arith.constant 0 : i32
    %c0_i32_0 = arith.constant 0 : i32
    return %arg1, %arg0, %c0_i32 : i32, i32, i32
  }
  func.func @transform_1(%arg0: i32, %arg1: i32) -> (i32, i32) {
    %c0_i32 = arith.constant 0 : i32
    %c0_i32_0 = arith.constant 0 : i32
    return %arg0, %c0_i32 : i32, i32
  }
  func.func @transform_2(%arg0: i32, %arg1: i32) -> (i32, i32) {
    %c0_i32 = arith.constant 0 : i32
    %c0_i32_0 = arith.constant 0 : i32
    return %arg0, %c0_i32 : i32, i32
  }
  func.func @transform_3(%arg0: i32, %arg1: i32) -> (i32, i32) {
    %c0_i32 = arith.constant 0 : i32
    %c0_i32_0 = arith.constant 0 : i32
    %c0_i32_1 = arith.constant 0 : i32
    return %c0_i32, %c0_i32_0 : i32, i32
  }
  func.func @transform_4(%arg0: i32, %arg1: i32) -> (i32, i32) {
    %c0_i32 = arith.constant 0 : i32
    %c0_i32_0 = arith.constant 0 : i32
    %c0_i32_1 = arith.constant 0 : i32
    return %c0_i32, %c0_i32_0 : i32, i32
  }
  func.func @transform_5(%arg0: i32, %arg1: i32) -> (i32, i32, i32) {
    %c0_i32 = arith.constant 0 : i32
    %c0_i32_0 = arith.constant 0 : i32
    return %arg1, %arg0, %c0_i32 : i32, i32, i32
  }
}

module attributes {stable_mosaic.version = 11 : i64} {
  func.func @spiral_kernel(%arg0: i32, %arg1: i32, %arg2: memref<1x8x128xf32, #tpu.memory_space<vmem>>, %arg3: memref<8x128xf32, #tpu.memory_space<vmem>>, %arg4: memref<8x128xf32, #tpu.memory_space<vmem>>, %arg5: memref<128x128xf32, #tpu.memory_space<vmem>>, %arg6: memref<1x128xf32, #tpu.memory_space<vmem>>, %arg7: memref<1x8x128xf32, #tpu.memory_space<vmem>>) attributes {dimension_semantics = [#tpu.dimension_semantics<parallel>, #tpu.dimension_semantics<parallel>], iteration_bounds = array<i64: 1, 2>, scalar_prefetch = 0 : i64, scratch_operands = 0 : i64, tpu.core_type = #tpu.core_type<tc>, window_params = [{transform_indices = @transform_0, window_bounds = array<i64: 1, 8, 128>}, {transform_indices = @transform_1, window_bounds = array<i64: 8, 128>}, {transform_indices = @transform_2, window_bounds = array<i64: 8, 128>}, {pipeline_mode = #tpu.pipeline_mode<synchronous>, transform_indices = @transform_3, window_bounds = array<i64: 128, 128>}, {pipeline_mode = #tpu.pipeline_mode<synchronous>, transform_indices = @transform_4, window_bounds = array<i64: 1, 128>}, {transform_indices = @transform_5, window_bounds = array<i64: 1, 8, 128>}]} {
    %c0 = arith.constant 0 : index
    %c0_0 = arith.constant 0 : index
    %c0_1 = arith.constant 0 : index
    %0 = vector.load %arg2[%c0, %c0_0, %c0_1] : memref<1x8x128xf32, #tpu.memory_space<vmem>>, vector<1x8x128xf32>
    %1 = vector.shape_cast %0 : vector<1x8x128xf32> to vector<8x128xf32>
    %c1_i32 = arith.constant 1 : i32
    %2 = tpu.dynamic_rotate %1 by %c1_i32 dim 1 : vector<8x128xf32>, i32 -> vector<8x128xf32>
    %c2_i32 = arith.constant 2 : i32
    %3 = tpu.dynamic_rotate %1 by %c2_i32 dim 1 : vector<8x128xf32>, i32 -> vector<8x128xf32>
    %c0_2 = arith.constant 0 : index
    %c0_3 = arith.constant 0 : index
    %4 = vector.load %arg4[%c0_2, %c0_3] : memref<8x128xf32, #tpu.memory_space<vmem>>, vector<8x128xf32>
    %cst = arith.constant 0.000000e+00 : f32
    %5 = vector.broadcast %cst : f32 to vector<8x128xf32>
    %6 = arith.cmpf one, %4, %5 : vector<8x128xf32>
    %c0_4 = arith.constant 0 : index
    %c0_5 = arith.constant 0 : index
    %7 = vector.load %arg3[%c0_4, %c0_5] : memref<8x128xf32, #tpu.memory_space<vmem>>, vector<8x128xf32>
    %cst_6 = arith.constant 0.000000e+00 : f32
    %8 = vector.broadcast %cst_6 : f32 to vector<8x128xf32>
    %9 = arith.cmpf one, %7, %8 : vector<8x128xf32>
    %10 = arith.select %9, %2, %1 : vector<8x128xi1>, vector<8x128xf32>
    %11 = arith.select %6, %3, %10 : vector<8x128xi1>, vector<8x128xf32>
    %c0_7 = arith.constant 0 : index
    %c0_8 = arith.constant 0 : index
    %12 = vector.load %arg5[%c0_7, %c0_8] : memref<128x128xf32, #tpu.memory_space<vmem>>, vector<128x128xf32>
    %cst_9 = arith.constant dense<0.000000e+00> : vector<8x128xf32>
    %13 = tpu.matmul %11, %12, %cst_9 {dimension_numbers = #tpu.dot_dimension_numbers<[1], [0], [0], [1], [0, 0, 1, 1], [], []>} : vector<8x128xf32>, vector<128x128xf32>, vector<8x128xf32> -> vector<8x128xf32>
    %c0_10 = arith.constant 0 : index
    %c0_11 = arith.constant 0 : index
    %14 = vector.load %arg6[%c0_10, %c0_11] : memref<1x128xf32, #tpu.memory_space<vmem>>, vector<1x128xf32>
    %15 = vector.broadcast %14 : vector<1x128xf32> to vector<8x128xf32>
    %16 = arith.addf %13, %15 : vector<8x128xf32>
    %c0_12 = arith.constant 0 : index
    %c0_13 = arith.constant 0 : index
    %c0_14 = arith.constant 0 : index
    %17 = vector.load %arg7[%c0_12, %c0_13, %c0_14] : memref<1x8x128xf32, #tpu.memory_space<vmem>>, vector<1x8x128xf32>
    %18 = vector.shape_cast %17 : vector<1x8x128xf32> to vector<8x128xf32>
    %19 = vector.shape_cast %16 : vector<8x128xf32> to vector<1x8x128xf32>
    tpu.vector_store %arg7[%c0_12, %c0_13, %c0_14], %19 {strides = array<i32>} : memref<1x8x128xf32, #tpu.memory_space<vmem>>, vector<1x8x128xf32>,
    return
  }
  func.func @transform_0(%arg0: i32, %arg1: i32) -> (i32, i32, i32) {
    %c0_i32 = arith.constant 0 : i32
    %c0_i32_0 = arith.constant 0 : i32
    return %arg1, %arg0, %c0_i32 : i32, i32, i32
  }
  func.func @transform_1(%arg0: i32, %arg1: i32) -> (i32, i32) {
    %c0_i32 = arith.constant 0 : i32
    %c0_i32_0 = arith.constant 0 : i32
    return %arg0, %c0_i32 : i32, i32
  }
  func.func @transform_2(%arg0: i32, %arg1: i32) -> (i32, i32) {
    %c0_i32 = arith.constant 0 : i32
    %c0_i32_0 = arith.constant 0 : i32
    return %arg0, %c0_i32 : i32, i32
  }
  func.func @transform_3(%arg0: i32, %arg1: i32) -> (i32, i32) {
    %c0_i32 = arith.constant 0 : i32
    %c0_i32_0 = arith.constant 0 : i32
    %c0_i32_1 = arith.constant 0 : i32
    return %c0_i32, %c0_i32_0 : i32, i32
  }
  func.func @transform_4(%arg0: i32, %arg1: i32) -> (i32, i32) {
    %c0_i32 = arith.constant 0 : i32
    %c0_i32_0 = arith.constant 0 : i32
    %c0_i32_1 = arith.constant 0 : i32
    return %c0_i32, %c0_i32_0 : i32, i32
  }
  func.func @transform_5(%arg0: i32, %arg1: i32) -> (i32, i32, i32) {
    %c0_i32 = arith.constant 0 : i32
    %c0_i32_0 = arith.constant 0 : i32
    return %arg1, %arg0, %c0_i32 : i32, i32, i32
  }
}

</mosaic_0001>

<bundles_post_ra>
// kernel: tpu_custom_call.1
= control target key start
LH: loop header
LB: loop body
LE: loop exit
PB: predicated region body
PF: predicated region fallthrough
CT: control target
= control target key end

     0   :  { %s1045_s0 = inlined_call_operand.hbm [shape: f32[2,8,128], index: 0, kind: input, shape index: {}]   ;;  %s1046_s1 = inlined_call_operand.hbm [shape: f32[8,128], index: 1, kind: input, shape index: {}]   ;;  %s1047_s2 = inlined_call_operand.hbm [shape: f32[8,128], index: 2, kind: input, shape index: {}]   ;;  %s1048_s3 = inlined_call_operand.hbm [shape: f32[128,128], index: 3, kind: input, shape index: {}]   ;;  %s1049_s4 = inlined_call_operand.vmem [shape: f32[1,128], index: 4, kind: input, shape index: {}]   ;;  %s1050_s5 = inlined_call_operand.hbm [shape: f32[2,8,128], index: 5, kind: output, shape index: {}]  }
   0x1   :  { %1051 = sst [smem:[#allocation15_spill]] %s1046_s1 }
   0x2   :  { %10 = vsyncpa [#allocation3], 0 }
   0x3   :  { %12 = vsyncpa [#allocation3 + $0x1], 0 }
   0x4   :  { %13 = vsyncpa [#allocation6], 0 }
   0x5   :  { %14 = vsyncpa [#allocation9], 0 }
   0x6   :  { %15 = vsyncpa [#allocation4], 0 }
   0x7   :  { %17 = vsyncpa [#allocation4 + $0x1], 0  ;;  %s867_s18 = smov 0   ;;  %s869_s19 = smov 0  }
   0x8   :  { %s871_s20 = smov 0   ;;  %s873_s21 = smov 0  }
   0x9   :  { %s875_s22 = smov 0   ;;  %s877_s23 = smov 0  }
   0xa LB: > { %s501_s24 = sadd.s32 4294967295, %s828_s23   ;;  %s502_s25 = sadd.s32 4294967294, %s828_s23   ;;  %s828_s23 = sphi %s877_s23, %s23_s23   ;;  %s824_s22 = sphi %s875_s22, %s1065_s22   ;;  %s820_s21 = sphi %s873_s21, %s1064_s21   ;;  %s816_s20 = sphi %s871_s20, %s1063_s20   ;;  %s812_s19 = sphi %s869_s19, %s1062_s19   ;;  %s808_s18 = sphi %s867_s18, %s1061_s18  }
   0xb   : > { %p57_p0 = scmp.ne.s32.totalorder %s812_s19, %s808_s18  ;;  %p901_p1 = scmp.eq.s32.totalorder %s501_s24, 0 }
   0xc   : > { %p905_p2 = scmp.eq.s32.totalorder %s501_s24, 1  ;;  %p183_p3 = scmp.eq.s32.totalorder %s502_s25, 1 }
   0xd   : > { %p911_p4 = por %p901_p1, %p57_p0  ;;  %p503_p5 = scmp.ge.s32.totalorder %s828_s23, 1 }
   0xe   : > { %p916_p6 = por %p183_p3, %p57_p0  ;;  %p190_p7 = scmp.lt.s32.totalorder %s828_s23, 3 }
   0xf   : > { %s1056_s1 = sld [smem:[#allocation15_spill]]  ;;  %p507_p9 = scmp.ge.s32.totalorder %s828_s23, 2 }
  0x10   : > { %p924_p8 = pnand %p503_p5, %p190_p7  ;;  %s830_s9 = smov [#allocation5]  }
  0x11   : > { %s206_s10 = sshll.u32 %s830_s9, 4  ;;  %s218_s13 = sshll.u32 %s1047_s2, 4  ;;  %s207_s10 = int_to_ptr.vmem [resolvable:$true] %s206_s10  ;;  %s219_s13 = int_to_ptr.hbm [resolvable:$true] %s218_s13 }
  0x12   : > { %p536_p10 = pneg %p924_p8  ;;  %s229_s17 = sshll.u32 %s1048_s3, 4  ;;  %s230_s17 = int_to_ptr.hbm [resolvable:$true] %s229_s17 }
  0x13   : > { %s831_s24 = smov [#allocation7]   ;;  %s832_s30 = smov [#allocation8]  }
  0x14   : > { %p936_p11 = pnand %p536_p10, %p901_p1  ;;  %s220_s25 = sshll.u32 %s831_s24, 4  ;;  %s221_s25 = int_to_ptr.vmem [resolvable:$true] %s220_s25 }
  0x15   : > { %s204_s7 = sshll.u32 %s1056_s1, 4  ;;  %s231_s6 = sshll.u32 %s832_s30, 4  ;;  %s205_s7 = int_to_ptr.hbm [resolvable:$true] %s204_s7  ;;  %s232_s6 = int_to_ptr.vmem [resolvable:$true] %s231_s6 }
  0x16   : > { %539 = dma.hbm_to_vmem [thread:$0]  (!%p936_p11), %s205_s7, 128, %s207_s10, [#allocation6]  }
  0x17   : > { %542 = dma.hbm_to_vmem [thread:$0]  (!%p936_p11), %s219_s13, 128, %s221_s25, [#allocation6]  }
  0x18   : > { %s833_s9 = smov 128   ;;  %s834_s11 = smov 8  }
  0x19   : > { %545 = dma.hbm_to_vmem [thread:$0]  (!%p936_p11), %s230_s17, 2048, %s232_s6, [#allocation9], %s833_s9, %s833_s9, %s834_s11  }
  0x1a   : > { %s44_s12 = sadd.s32 1, %s816_s20  ;;  %s32_s15 = sadd.s32 1, %s824_s22 }
  0x1b   : > { %p51_p12 = scmp.ne.s32.totalorder %s816_s20, %s812_s19  ;;  %p33_p13 = scmp.ge.s32.totalorder %s32_s15, 2 }
  0x1c   : > { %p52_p0 = scmp.eq.s32.totalorder %s828_s23, 0  ;;  %p557_p5 = scmp.lt.s32.totalorder %s828_s23, 2 }
  0x1d   : > { %p956_p3 = por %p905_p2, %p51_p12  ;;  %s1067_s15 = smov (%p33_p13, %s32_s15), 0 }
  0x1e   : > { %p963_p7 = por %p52_p0, %p51_p12  ;;  %s248_s13 = sand.u32 1, %s816_s20  }
  0x1f   : > { %s39_s14 = ssub.s32 %s824_s22, %s1067_s15  ;;  %s508_s16 = sshll.u32 %s248_s13, 3 }
  0x20   : > { %p42_p10 = scmp.eq.s32.totalorder %s39_s14, 0  ;;  %s509_s17 = sshll.u32 %s824_s22, 3 }
  0x21   : > { %s257_s30 = scalar_lea.hbm %s1045_s0, %s509_s17  ;;  %s252_s6 = scalar_lea.vmem [#allocation2], %s508_s16 }
  0x22   : > { %s972_s27 = scalar_select %p42_p10, %s816_s20, %s44_s12  }
  0x23   : > { %s261_s9 = sshll.u32 %s252_s6, 4  ;;  %s259_s11 = sshll.u32 %s257_s30, 4  ;;  %s262_s9 = int_to_ptr.vmem [resolvable:$true] %s261_s9  ;;  %s260_s11 = int_to_ptr.hbm [resolvable:$true] %s259_s11 }
  0x24   : > { %p547_p2 = pnand %p557_p5, %p963_p7  ;;  %s249_s1 = scalar_lea.sflag [#allocation3], %s248_s13 }
  0x25   : > { %270 = sbr.rel (%p924_p8) target bundleno = 303 (0x12f), region = 40  ;;  %s984_s12 = sand.u32 (!%p924_p8), 1, %s812_s19  }
  0x26   : > { %549 = dma.hbm_to_vmem [thread:$0]  (!%p547_p2), %s260_s11, 128, %s262_s9, %s249_s1  }
  0x27   : > { %s511_s14 = sshll.u32 (!%p924_p8), %s984_s12, 3  ;;  %s273_s16 = scalar_lea.sflag (!%p924_p8), [#allocation3], %s984_s12 }
  0x28   : > { %s276_s17 = scalar_lea.vmem (!%p924_p8), [#allocation2], %s511_s14 }
  0x2a   : > { %791 = dma.done.wait (%p911_p4), %s273_s16, 128  }
  0x2b   : > { %793 = vsyncadd (%p911_p4), %s273_s16, 4294967168 }
  0x2c   : > { %795 = dma.done.wait (%p901_p1), [#allocation6], 256  }
  0x2d   : > { %797 = vsyncadd (%p901_p1), [#allocation6], 4294967040 }
  0x2e   : > { %799 = dma.done.wait (%p901_p1), [#allocation9], 2048  }
  0x2f   : > { %801 = vsyncadd (%p901_p1), [#allocation9], 4294965248  ;;  %v319_v0 = vld [vmem:[%s276_s17] sm:$0xff]  ;;  %v345_v1 = vld [vmem:[#allocation8 + $0x78] sm:$0xff]  ;;  %s835_s1 = smov 1   ;;  %s836_s28 = smov 2  }
  0x30   : > { %v344_v2 = vld [vmem:[#allocation8 + $0x70] sm:$0xff]  ;;  %320 = vrot.lane.b32.xlu0 %v319_v0, %s835_s1  ;;  %350 = vmatpush.msra.mxu0 %v345_v1  ;;  %v343_v3 = vld [vmem:[#allocation8 + $0x68] sm:$0xff]  ;;  %v342_v4 = vld [vmem:[#allocation8 + $0x60] sm:$0xff]  ;;  %s517_s26 = sshll.u32 %s820_s21, 3  ;;  %s318_s30 = scalar_lea.vmem [#allocation10], %s511_s14 }
  0x31   : > { %v341_v5 = vld [vmem:[#allocation8 + $0x58] sm:$0xff]  ;;  %v340_v6 = vld [vmem:[#allocation8 + $0x50] sm:$0xff]  ;;  %v339_v7 = vld [vmem:[#allocation8 + $0x48] sm:$0xff]  ;;  %s383_s13 = scalar_lea.hbm %s1050_s5, %s517_s26  ;;  %s385_s6 = sshll.u32 %s318_s30, 4  ;;  %s386_s6 = int_to_ptr.vmem [resolvable:$true] %s385_s6 }
  0x32   : > { %351 = vmatpush.msra.mxu0 %v344_v2  ;;  %v338_v8 = vld [vmem:[#allocation8 + $0x40] sm:$0xff]  ;;  %v337_v9 = vld [vmem:[#allocation8 + $0x38] sm:$0xff]  ;;  %v336_v10 = vld [vmem:[#allocation8 + $0x30] sm:$0xff]  ;;  %s387_s9 = sshll.u32 %s383_s13, 4  ;;  %s372_s11 = scalar_lea.sflag [#allocation4], %s984_s12  ;;  %s388_s9 = int_to_ptr.hbm [resolvable:$true] %s387_s9 }
  0x33   : > { %v335_v11 = vld [vmem:[#allocation8 + $0x28] sm:$0xff]  ;;  %v334_v12 = vld [vmem:[#allocation8 + $0x20] sm:$0xff]  ;;  %v333_v13 = vld [vmem:[#allocation8 + $0x18] sm:$0xff]  ;;  %s752_s21 = sshra.s32 %s388_s9, 4  ;;  %s753_s21 = int_to_ptr.hbm [resolvable:$true] %s752_s21 }
  0x34   : > { %352 = vmatpush.msra.mxu0 %v343_v3  ;;  %v332_v14 = vld [vmem:[#allocation8 + $0x10] sm:$0xff]  ;;  %v331_v15 = vld [vmem:[#allocation8 + $0x8] sm:$0xff]  ;;  %v330_v16 = vld [vmem:[#allocation8] sm:$0xff]  ;;  %s754_s16 = scalar_lea.hbm %s753_s21, 8  ;;  %p759_p11 = scmp.lt.s32.totalorder %s753_s21, %s1050_s5 }
  0x35   : > { %v326_v18 = vld [vmem:[#allocation5] sm:$0xff]  ;;  %v324_v19 = vld [vmem:[#allocation7] sm:$0xff]  ;;  %v617_v23 = vld [vmem:[%s1049_s4] ss:$0 sm:$0xff]  ;;  %p755_p1 = scmp.ne.s32.totalorder %s753_s21, %s754_s16 }
  0x36   : > { %353 = vmatpush.msra.mxu0 %v342_v4  ;;  %vm327_vm0 = vcmp.ne.f32.partialorder %v326_v18, 0.0  ;;  %vm325_vm1 = vcmp.ne.f32.partialorder %v324_v19, 0.0 }
  0x37   : > { %p756_p4 = pnand %p755_p1, %p956_p3 }
  0x38   : > { %322 = vrot.lane.b32.xlu0 %v319_v0, %s836_s28  ;;  %354 = vmatpush.msra.mxu0 %v341_v5  ;;  %s758_s28 = scalar_lea.hbm %s1050_s5, 16 }
  0x39   : > { %p757_p8 = pneg %p756_p4  ;;  %p760_p12 = scmp.lt.s32.totalorder %s758_s28, %s754_s16 }
  0x3a   : > { %355 = vmatpush.msra.mxu0 %v340_v6 }
  0x3b   : > { %p761_p13 = por %p760_p12, %p759_p11 }
  0x3c   : > { %356 = vmatpush.msra.mxu0 %v339_v7 }
  0x3d   : > { %p762_p0 = pnand %p761_p13, %p757_p8 }
  0x3e   : > { %357 = vmatpush.msra.mxu0 %v338_v8 }
  0x40   : > { %358 = vmatpush.msra.mxu0 %v337_v9 }
  0x42   : > { %359 = vmatpush.msra.mxu0 %v336_v10 }
  0x44   : > { %360 = vmatpush.msra.mxu0 %v335_v11 }
  0x46   : > { %361 = vmatpush.msra.mxu0 %v334_v12 }
  0x48   : > { %362 = vmatpush.msra.mxu0 %v333_v13 }
  0x4a   : > { %363 = vmatpush.msra.mxu0 %v332_v14 }
  0x4c   : > { %364 = vmatpush.msra.mxu0 %v331_v15 }
  0x4e   : > { %365 = vmatpush.msra.mxu0 %v330_v16 }
  0xa2   : > { %v321_v17 = vpop.permute.xlu0 %320 }
  0xa3   : > { %v328_v20 = vsel %vm327_vm0, %v321_v17, %v319_v0 }
  0xaa   : > { %v323_v21 = vpop.permute.xlu0 %322 }
  0xab   : > { %v329_v22 = vsel %vm325_vm1, %v323_v21, %v328_v20 }
  0xac   : > { %366 = vmatmul.f32.vlgmr.msra.gmra.mxu0 %v329_v22 }
 0x129   : > { %v367_v24 = vpop.f32.mrf.mxu0 }
 0x12a   : > { %v368_v25 = vadd.f32 %v617_v23, %v367_v24 }
 0x12c   : > { %370 = vst [vmem:[%s318_s30] sm:$0xff] %v368_v25 }
 0x12d   : > { %765 = shalt.err (!%p762_p0)
}
 0x12e   : > { %534 = dma.vmem_to_hbm [thread:$0]  (%p956_p3), %s386_s6, 128, %s388_s9, %s372_s11  }
 0x12f PF: > { %s399_s12 = sand.u32 1, %s808_s18   ;;  %p551_p5 = pnand %p507_p9, %p916_p6 }
 0x130   : > { %s400_s8 = scalar_lea.sflag [#allocation4], %s399_s12 }
 0x131   : > { %p552_p7 = pneg %p551_p5 }
 0x133   : > { %803 = dma.done.wait (%p552_p7), %s400_s8, 128  }
 0x134   : > { %805 = vsyncadd (%p552_p7), %s400_s8, 4294967168  ;;  %s23_s23 = sadd.s32 1, %s828_s23   ;;  %s1061_s18 = smov %s812_s19 }
 0x135   : > { %p20_p10 = scmp.ge.s32.totalorder %s23_s23, 4   ;;  %s1062_s19 = smov %s816_s20 }
 0x136   : > { %s1063_s20 = smov %s972_s27  ;;  %s1064_s21 = smov %s824_s22 }
 0x137   : > { %s1065_s22 = smov %s1067_s15  ;;  %22 = sbr.rel (!%p20_p10) target bundleno = 10 (0xa), region = 99 }
 0x13c   :  { %406 = vsyncpa [#allocation3], 1 }
 0x13d   :  { %408 = vsyncpa [#allocation3 + $0x1], 1 }
 0x13e   :  { %409 = vsyncpa [#allocation6], 1 }
 0x13f   :  { %410 = vsyncpa [#allocation9], 1 }
 0x140   :  { %411 = vsyncpa [#allocation4], 1 }
 0x141   :  { %413 = vsyncpa [#allocation4 + $0x1], 1 }

// kernel: tpu_custom_call.1
= control target key start
LH: loop header
LB: loop body
LE: loop exit
PB: predicated region body
PF: predicated region fallthrough
CT: control target
= control target key end

     0   :  { %s1045_s0 = inlined_call_operand.hbm [shape: f32[2,8,128], index: 0, kind: input, shape index: {}]   ;;  %s1046_s1 = inlined_call_operand.hbm [shape: f32[8,128], index: 1, kind: input, shape index: {}]   ;;  %s1047_s2 = inlined_call_operand.hbm [shape: f32[8,128], index: 2, kind: input, shape index: {}]   ;;  %s1048_s3 = inlined_call_operand.hbm [shape: f32[128,128], index: 3, kind: input, shape index: {}]   ;;  %s1049_s4 = inlined_call_operand.vmem [shape: f32[1,128], index: 4, kind: input, shape index: {}]   ;;  %s1050_s5 = inlined_call_operand.hbm [shape: f32[2,8,128], index: 5, kind: output, shape index: {}]  }
   0x1   :  { %1051 = sst [smem:[#allocation15_spill]] %s1046_s1 }
   0x2   :  { %10 = vsyncpa [#allocation3], 0 }
   0x3   :  { %12 = vsyncpa [#allocation3 + $0x1], 0 }
   0x4   :  { %13 = vsyncpa [#allocation6], 0 }
   0x5   :  { %14 = vsyncpa [#allocation9], 0 }
   0x6   :  { %15 = vsyncpa [#allocation4], 0 }
   0x7   :  { %17 = vsyncpa [#allocation4 + $0x1], 0  ;;  %s867_s18 = smov 0   ;;  %s869_s19 = smov 0  }
   0x8   :  { %s871_s20 = smov 0   ;;  %s873_s21 = smov 0  }
   0x9   :  { %s875_s22 = smov 0   ;;  %s877_s23 = smov 0  }
   0xa LB: > { %s501_s24 = sadd.s32 4294967295, %s828_s23   ;;  %s502_s25 = sadd.s32 4294967294, %s828_s23   ;;  %s828_s23 = sphi %s877_s23, %s23_s23   ;;  %s824_s22 = sphi %s875_s22, %s1065_s22   ;;  %s820_s21 = sphi %s873_s21, %s1064_s21   ;;  %s816_s20 = sphi %s871_s20, %s1063_s20   ;;  %s812_s19 = sphi %s869_s19, %s1062_s19   ;;  %s808_s18 = sphi %s867_s18, %s1061_s18  }
   0xb   : > { %p57_p0 = scmp.ne.s32.totalorder %s812_s19, %s808_s18  ;;  %p901_p1 = scmp.eq.s32.totalorder %s501_s24, 0 }
   0xc   : > { %p905_p2 = scmp.eq.s32.totalorder %s501_s24, 1  ;;  %p183_p3 = scmp.eq.s32.totalorder %s502_s25, 1 }
   0xd   : > { %p911_p4 = por %p901_p1, %p57_p0  ;;  %p503_p5 = scmp.ge.s32.totalorder %s828_s23, 1 }
   0xe   : > { %p916_p6 = por %p183_p3, %p57_p0  ;;  %p190_p7 = scmp.lt.s32.totalorder %s828_s23, 3 }
   0xf   : > { %s1056_s1 = sld [smem:[#allocation15_spill]]  ;;  %p507_p9 = scmp.ge.s32.totalorder %s828_s23, 2 }
  0x10   : > { %p924_p8 = pnand %p503_p5, %p190_p7  ;;  %s830_s9 = smov [#allocation5]  }
  0x11   : > { %s206_s10 = sshll.u32 %s830_s9, 4  ;;  %s218_s13 = sshll.u32 %s1047_s2, 4  ;;  %s207_s10 = int_to_ptr.vmem [resolvable:$true] %s206_s10  ;;  %s219_s13 = int_to_ptr.hbm [resolvable:$true] %s218_s13 }
  0x12   : > { %p536_p10 = pneg %p924_p8  ;;  %s229_s17 = sshll.u32 %s1048_s3, 4  ;;  %s230_s17 = int_to_ptr.hbm [resolvable:$true] %s229_s17 }
  0x13   : > { %s831_s24 = smov [#allocation7]   ;;  %s832_s30 = smov [#allocation8]  }
  0x14   : > { %p936_p11 = pnand %p536_p10, %p901_p1  ;;  %s220_s25 = sshll.u32 %s831_s24, 4  ;;  %s221_s25 = int_to_ptr.vmem [resolvable:$true] %s220_s25 }
  0x15   : > { %s204_s7 = sshll.u32 %s1056_s1, 4  ;;  %s231_s6 = sshll.u32 %s832_s30, 4  ;;  %s205_s7 = int_to_ptr.hbm [resolvable:$true] %s204_s7  ;;  %s232_s6 = int_to_ptr.vmem [resolvable:$true] %s231_s6 }
  0x16   : > { %539 = dma.hbm_to_vmem [thread:$0]  (!%p936_p11), %s205_s7, 128, %s207_s10, [#allocation6]  }
  0x17   : > { %542 = dma.hbm_to_vmem [thread:$0]  (!%p936_p11), %s219_s13, 128, %s221_s25, [#allocation6]  }
  0x18   : > { %s833_s9 = smov 128   ;;  %s834_s11 = smov 8  }
  0x19   : > { %545 = dma.hbm_to_vmem [thread:$0]  (!%p936_p11), %s230_s17, 2048, %s232_s6, [#allocation9], %s833_s9, %s833_s9, %s834_s11  }
  0x1a   : > { %s44_s12 = sadd.s32 1, %s816_s20  ;;  %s32_s15 = sadd.s32 1, %s824_s22 }
  0x1b   : > { %p51_p12 = scmp.ne.s32.totalorder %s816_s20, %s812_s19  ;;  %p33_p13 = scmp.ge.s32.totalorder %s32_s15, 2 }
  0x1c   : > { %p52_p0 = scmp.eq.s32.totalorder %s828_s23, 0  ;;  %p557_p5 = scmp.lt.s32.totalorder %s828_s23, 2 }
  0x1d   : > { %p956_p3 = por %p905_p2, %p51_p12  ;;  %s1067_s15 = smov (%p33_p13, %s32_s15), 0 }
  0x1e   : > { %p963_p7 = por %p52_p0, %p51_p12  ;;  %s248_s13 = sand.u32 1, %s816_s20  }
  0x1f   : > { %s39_s14 = ssub.s32 %s824_s22, %s1067_s15  ;;  %s508_s16 = sshll.u32 %s248_s13, 3 }
  0x20   : > { %p42_p10 = scmp.eq.s32.totalorder %s39_s14, 0  ;;  %s509_s17 = sshll.u32 %s824_s22, 3 }
  0x21   : > { %s257_s30 = scalar_lea.hbm %s1045_s0, %s509_s17  ;;  %s252_s6 = scalar_lea.vmem [#allocation2], %s508_s16 }
  0x22   : > { %s972_s27 = scalar_select %p42_p10, %s816_s20, %s44_s12  }
  0x23   : > { %s261_s9 = sshll.u32 %s252_s6, 4  ;;  %s259_s11 = sshll.u32 %s257_s30, 4  ;;  %s262_s9 = int_to_ptr.vmem [resolvable:$true] %s261_s9  ;;  %s260_s11 = int_to_ptr.hbm [resolvable:$true] %s259_s11 }
  0x24   : > { %p547_p2 = pnand %p557_p5, %p963_p7  ;;  %s249_s1 = scalar_lea.sflag [#allocation3], %s248_s13 }
  0x25   : > { %270 = sbr.rel (%p924_p8) target bundleno = 303 (0x12f), region = 40  ;;  %s984_s12 = sand.u32 (!%p924_p8), 1, %s812_s19  }
  0x26   : > { %549 = dma.hbm_to_vmem [thread:$0]  (!%p547_p2), %s260_s11, 128, %s262_s9, %s249_s1  }
  0x27   : > { %s511_s14 = sshll.u32 (!%p924_p8), %s984_s12, 3  ;;  %s273_s16 = scalar_lea.sflag (!%p924_p8), [#allocation3], %s984_s12 }
  0x28   : > { %s276_s17 = scalar_lea.vmem (!%p924_p8), [#allocation2], %s511_s14 }
  0x2a   : > { %791 = dma.done.wait (%p911_p4), %s273_s16, 128  }
  0x2b   : > { %793 = vsyncadd (%p911_p4), %s273_s16, 4294967168 }
  0x2c   : > { %795 = dma.done.wait (%p901_p1), [#allocation6], 256  }
  0x2d   : > { %797 = vsyncadd (%p901_p1), [#allocation6], 4294967040 }
  0x2e   : > { %799 = dma.done.wait (%p901_p1), [#allocation9], 2048  }
  0x2f   : > { %801 = vsyncadd (%p901_p1), [#allocation9], 4294965248  ;;  %v319_v0 = vld [vmem:[%s276_s17] sm:$0xff]  ;;  %v345_v1 = vld [vmem:[#allocation8 + $0x78] sm:$0xff]  ;;  %s835_s1 = smov 1   ;;  %s836_s28 = smov 2  }
  0x30   : > { %v344_v2 = vld [vmem:[#allocation8 + $0x70] sm:$0xff]  ;;  %320 = vrot.lane.b32.xlu0 %v319_v0, %s835_s1  ;;  %350 = vmatpush.msra.mxu0 %v345_v1  ;;  %v343_v3 = vld [vmem:[#allocation8 + $0x68] sm:$0xff]  ;;  %v342_v4 = vld [vmem:[#allocation8 + $0x60] sm:$0xff]  ;;  %s517_s26 = sshll.u32 %s820_s21, 3  ;;  %s318_s30 = scalar_lea.vmem [#allocation10], %s511_s14 }
  0x31   : > { %v341_v5 = vld [vmem:[#allocation8 + $0x58] sm:$0xff]  ;;  %v340_v6 = vld [vmem:[#allocation8 + $0x50] sm:$0xff]  ;;  %v339_v7 = vld [vmem:[#allocation8 + $0x48] sm:$0xff]  ;;  %s383_s13 = scalar_lea.hbm %s1050_s5, %s517_s26  ;;  %s385_s6 = sshll.u32 %s318_s30, 4  ;;  %s386_s6 = int_to_ptr.vmem [resolvable:$true] %s385_s6 }
  0x32   : > { %351 = vmatpush.msra.mxu0 %v344_v2  ;;  %v338_v8 = vld [vmem:[#allocation8 + $0x40] sm:$0xff]  ;;  %v337_v9 = vld [vmem:[#allocation8 + $0x38] sm:$0xff]  ;;  %v336_v10 = vld [vmem:[#allocation8 + $0x30] sm:$0xff]  ;;  %s387_s9 = sshll.u32 %s383_s13, 4  ;;  %s372_s11 = scalar_lea.sflag [#allocation4], %s984_s12  ;;  %s388_s9 = int_to_ptr.hbm [resolvable:$true] %s387_s9 }
  0x33   : > { %v335_v11 = vld [vmem:[#allocation8 + $0x28] sm:$0xff]  ;;  %v334_v12 = vld [vmem:[#allocation8 + $0x20] sm:$0xff]  ;;  %v333_v13 = vld [vmem:[#allocation8 + $0x18] sm:$0xff]  ;;  %s752_s21 = sshra.s32 %s388_s9, 4  ;;  %s753_s21 = int_to_ptr.hbm [resolvable:$true] %s752_s21 }
  0x34   : > { %352 = vmatpush.msra.mxu0 %v343_v3  ;;  %v332_v14 = vld [vmem:[#allocation8 + $0x10] sm:$0xff]  ;;  %v331_v15 = vld [vmem:[#allocation8 + $0x8] sm:$0xff]  ;;  %v330_v16 = vld [vmem:[#allocation8] sm:$0xff]  ;;  %s754_s16 = scalar_lea.hbm %s753_s21, 8  ;;  %p759_p11 = scmp.lt.s32.totalorder %s753_s21, %s1050_s5 }
  0x35   : > { %v326_v18 = vld [vmem:[#allocation5] sm:$0xff]  ;;  %v324_v19 = vld [vmem:[#allocation7] sm:$0xff]  ;;  %v617_v23 = vld [vmem:[%s1049_s4] ss:$0 sm:$0xff]  ;;  %p755_p1 = scmp.ne.s32.totalorder %s753_s21, %s754_s16 }
  0x36   : > { %353 = vmatpush.msra.mxu0 %v342_v4  ;;  %vm327_vm0 = vcmp.ne.f32.partialorder %v326_v18, 0.0  ;;  %vm325_vm1 = vcmp.ne.f32.partialorder %v324_v19, 0.0 }
  0x37   : > { %p756_p4 = pnand %p755_p1, %p956_p3 }
  0x38   : > { %322 = vrot.lane.b32.xlu0 %v319_v0, %s836_s28  ;;  %354 = vmatpush.msra.mxu0 %v341_v5  ;;  %s758_s28 = scalar_lea.hbm %s1050_s5, 16 }
  0x39   : > { %p757_p8 = pneg %p756_p4  ;;  %p760_p12 = scmp.lt.s32.totalorder %s758_s28, %s754_s16 }
  0x3a   : > { %355 = vmatpush.msra.mxu0 %v340_v6 }
  0x3b   : > { %p761_p13 = por %p760_p12, %p759_p11 }
  0x3c   : > { %356 = vmatpush.msra.mxu0 %v339_v7 }
  0x3d   : > { %p762_p0 = pnand %p761_p13, %p757_p8 }
  0x3e   : > { %357 = vmatpush.msra.mxu0 %v338_v8 }
  0x40   : > { %358 = vmatpush.msra.mxu0 %v337_v9 }
  0x42   : > { %359 = vmatpush.msra.mxu0 %v336_v10 }
  0x44   : > { %360 = vmatpush.msra.mxu0 %v335_v11 }
  0x46   : > { %361 = vmatpush.msra.mxu0 %v334_v12 }
  0x48   : > { %362 = vmatpush.msra.mxu0 %v333_v13 }
  0x4a   : > { %363 = vmatpush.msra.mxu0 %v332_v14 }
  0x4c   : > { %364 = vmatpush.msra.mxu0 %v331_v15 }
  0x4e   : > { %365 = vmatpush.msra.mxu0 %v330_v16 }
  0xa2   : > { %v321_v17 = vpop.permute.xlu0 %320 }
  0xa3   : > { %v328_v20 = vsel %vm327_vm0, %v321_v17, %v319_v0 }
  0xaa   : > { %v323_v21 = vpop.permute.xlu0 %322 }
  0xab   : > { %v329_v22 = vsel %vm325_vm1, %v323_v21, %v328_v20 }
  0xac   : > { %366 = vmatmul.f32.vlgmr.msra.gmra.mxu0 %v329_v22 }
 0x129   : > { %v367_v24 = vpop.f32.mrf.mxu0 }
 0x12a   : > { %v368_v25 = vadd.f32 %v617_v23, %v367_v24 }
 0x12c   : > { %370 = vst [vmem:[%s318_s30] sm:$0xff] %v368_v25 }
 0x12d   : > { %765 = shalt.err (!%p762_p0)
}
 0x12e   : > { %534 = dma.vmem_to_hbm [thread:$0]  (%p956_p3), %s386_s6, 128, %s388_s9, %s372_s11  }
 0x12f PF: > { %s399_s12 = sand.u32 1, %s808_s18   ;;  %p551_p5 = pnand %p507_p9, %p916_p6 }
 0x130   : > { %s400_s8 = scalar_lea.sflag [#allocation4], %s399_s12 }
 0x131   : > { %p552_p7 = pneg %p551_p5 }
 0x133   : > { %803 = dma.done.wait (%p552_p7), %s400_s8, 128  }
 0x134   : > { %805 = vsyncadd (%p552_p7), %s400_s8, 4294967168  ;;  %s23_s23 = sadd.s32 1, %s828_s23   ;;  %s1061_s18 = smov %s812_s19 }
 0x135   : > { %p20_p10 = scmp.ge.s32.totalorder %s23_s23, 4   ;;  %s1062_s19 = smov %s816_s20 }
 0x136   : > { %s1063_s20 = smov %s972_s27  ;;  %s1064_s21 = smov %s824_s22 }
 0x137   : > { %s1065_s22 = smov %s1067_s15  ;;  %22 = sbr.rel (!%p20_p10) target bundleno = 10 (0xa), region = 99 }
 0x13c   :  { %406 = vsyncpa [#allocation3], 1 }
 0x13d   :  { %408 = vsyncpa [#allocation3 + $0x1], 1 }
 0x13e   :  { %409 = vsyncpa [#allocation6], 1 }
 0x13f   :  { %410 = vsyncpa [#allocation9], 1 }
 0x140   :  { %411 = vsyncpa [#allocation4], 1 }
 0x141   :  { %413 = vsyncpa [#allocation4 + $0x1], 1 }

</bundles_post_ra>
